<compile_context>
chip_gen: v7x
topology: tpu7x:2x2x1
jax: 0.10.0
libtpu: 0.0.40
codegen_flags: <defaults>
</compile_context>

<pallas_src>
import numpy as np
import jax
import jax.numpy as jnp
from jax.experimental import pallas as pl
from jax.experimental.pallas import tpu as pltpu


_BLOCK_T_CAP = 1024          # per-step time tile cap (VMEM-safe on v5e/v6e/v7x)


def _round_up(x, m):
    return ((x + m - 1) // m) * m


# ----------------------------------------------------------------------------
# Fused kernel factory.  grid = (B, nt):   b = batch row (parallel),
#                                          k = time tile (arbitrary / reduction)
# ----------------------------------------------------------------------------
def _make_kernel(t_true, fd, nt):
    def kernel(seqlen_ref,                        # SMEM (B,) int32 (prefetch)
               spw_ref, hs_ref, cw_ref, wvb_ref,  # inputs
               glimpse_ref, alpha_ref,            # outputs
               m_sc, l_sc, acc_sc):               # scratch (used only if nt>1)
        b = pl.program_id(0)
        k = pl.program_id(1)
        tb = hs_ref.shape[1]
        kp = hs_ref.shape[2]
        en = cw_ref.shape[1]

        if nt > 1:
            @pl.when(k == 0)
            def _init():
                m_sc[...] = jnp.full_like(m_sc, -1e30)
                l_sc[...] = jnp.zeros_like(l_sc)
                acc_sc[...] = jnp.zeros_like(acc_sc)

        # One MXU matmul: [hs | conv-patches] @ [V^T ; F∘U]  (bf16 in, f32 acc).
        x = hs_ref[...]                                        # (1, tb, kp) bf16
        x2 = x.reshape(tb, kp)
        pre = jnp.dot(x2, cw_ref[...],
                      preferred_element_type=jnp.float32).reshape(1, tb, en)
        c = jnp.tanh(pre + spw_ref[...])                       # + W(sp)+Wb+Ub+Vb
        energy = jnp.sum(c * wvb_ref[0:1, :], axis=-1)         # (1, tb) lane-dense

        # In-kernel validity mask from seq_len (also masks lane padding past T).
        t_ids = k * tb + jax.lax.broadcasted_iota(jnp.int32, (1, tb), 1)
        valid = (t_ids < seqlen_ref[b]) & (t_ids < t_true)
        energy = jnp.where(valid, energy, -1e30)

        def write_glimpse(acc_row, inv_l):
            # glimpse = (sum_t alpha_t hs_t) @ V^T + V_b   (exact: sum alpha = 1)
            g = (acc_row * inv_l)[:, :fd].astype(jnp.bfloat16)         # (1, fd)
            gout = jnp.dot(g, cw_ref[:fd, :],
                           preferred_element_type=jnp.float32) + wvb_ref[1:2, :]
            glimpse_ref[...] = gout.reshape(1, 1, en)

        if nt == 1:
            # Single-tile fast path: plain softmax, no carries, no alpha rewrite.
            m_new = jnp.max(energy, axis=-1, keepdims=True)
            p = jnp.exp(energy - m_new) * valid.astype(jnp.float32)    # (1, tb)
            l = jnp.sum(p, axis=-1, keepdims=True)
            acc = jnp.dot(p.astype(jnp.bfloat16), x2,
                          preferred_element_type=jnp.float32)          # (1, kp)
            inv_l = pl.reciprocal(l, approx=True)
            alpha_ref[...] = (p * inv_l).reshape(1, 1, tb)
            write_glimpse(acc, inv_l)
        else:
            # Online softmax over time tiles; raw energies parked in alpha_ref.
            start = pl.multiple_of(k * tb, 128)
            alpha_ref[:, :, pl.ds(start, tb)] = energy.reshape(1, 1, tb)

            m_prev = m_sc[...]
            m_new = jnp.maximum(m_prev, jnp.max(energy, axis=-1, keepdims=True))
            corr = jnp.exp(m_prev - m_new)
            p = jnp.exp(energy - m_new) * valid.astype(jnp.float32)
            l_sc[...] = corr * l_sc[...] + jnp.sum(p, axis=-1, keepdims=True)
            acc_sc[...] = corr * acc_sc[...] + jnp.dot(
                p.astype(jnp.bfloat16), x2, preferred_element_type=jnp.float32)
            m_sc[...] = m_new

            @pl.when(k == nt - 1)
            def _finalize():
                inv_l = pl.reciprocal(l_sc[...], approx=True)
                write_glimpse(acc_sc[...], inv_l)
                alpha_ref[...] = jnp.exp(alpha_ref[...] - m_sc[...]) * inv_l

    return kernel


# ----------------------------------------------------------------------------
# Wrapper: layout/algebraic prep (fused under jit) + one pallas_call.
# ----------------------------------------------------------------------------
def _forward(sp, hs, alpha, seq_len, params):
    """sp (B,hid), hs (T,B,feat), alpha (T,B,1), seq_len (B,) or None."""
    T, B, Fd = hs.shape
    en = params['W_w'].shape[0]

    block_t = min(_BLOCK_T_CAP, _round_up(T, 128))
    t_pad = _round_up(T, block_t)
    nt = t_pad // block_t
    kp = _round_up(Fd + 9, 8)                          # conv kernel size = 9

    # --- operand prep (bf16 only on MXU operands) -----------------------------
    hs_b = jnp.transpose(hs, (1, 0, 2))                                # (B,T,Fd)
    a_bt = jnp.transpose(alpha[:, :, 0], (1, 0))                       # (B,T)
    a_pad = jnp.pad(a_bt, ((0, 0), (4, 4)))
    idx = jnp.arange(T)[:, None] + jnp.arange(9)[None, :]
    patches = a_pad[:, idx]                                            # (B,T,9)
    hs_cat = jnp.concatenate([hs_b, patches], axis=-1)                 # (B,T,Fd+9)
    hs_cat = jnp.pad(hs_cat,
                     ((0, 0), (0, t_pad - T), (0, kp - Fd - 9))
                     ).astype(jnp.bfloat16)                            # (B,t_pad,kp)

    # combined weight: rows [0:Fd)=V^T, [Fd:Fd+9)=F∘U (fused Conv1d∘U), rest 0
    w_eff = jnp.einsum('ck,ec->ke', params['F_w'][:, 0, :], params['U_w'])  # (9,en)
    cw = jnp.concatenate(
        [params['V_w'].T, w_eff,
         jnp.zeros((kp - Fd - 9, en), params['V_w'].dtype)], axis=0
    ).astype(jnp.bfloat16)                                             # (kp,en)

    # W(sp) + (W_b + U_b + V_b), once per call, full f32
    spw = sp @ params['W_w'].T + params['W_b'] + params['U_b'] + params['V_b']
    spw3 = spw.astype(jnp.float32)[:, None, :]                         # (B,1,en)

    # packed small vectors: row0 = w (energy dot), row1 = V_b (glimpse finalize)
    wvb = jnp.stack([params['w_w'][0], params['V_b']]).astype(jnp.float32)

    if seq_len is None:
        sl = jnp.full((B,), T, jnp.int32)
    else:
        sl = jnp.asarray(seq_len, jnp.int32)

    kernel = _make_kernel(T, Fd, nt)
    glimpse3, alpha3 = pl.pallas_call(
        kernel,
        out_shape=(jax.ShapeDtypeStruct((B, 1, en), jnp.float32),
                   jax.ShapeDtypeStruct((B, 1, t_pad), jnp.float32)),
        grid_spec=pltpu.PrefetchScalarGridSpec(
            num_scalar_prefetch=1,
            grid=(B, nt),
            in_specs=[
                pl.BlockSpec((1, 1, en), lambda b, k, _sl: (b, 0, 0)),        # W(sp)+b
                pl.BlockSpec((1, block_t, kp), lambda b, k, _sl: (b, k, 0)),  # hs|patch
                pl.BlockSpec((kp, en), lambda b, k, _sl: (0, 0)),             # [V^T;F∘U]
                pl.BlockSpec((2, en), lambda b, k, _sl: (0, 0)),              # [w;V_b]
            ],
            out_specs=(
                pl.BlockSpec((1, 1, en), lambda b, k, _sl: (b, 0, 0)),        # glimpse
                pl.BlockSpec((1, 1, t_pad), lambda b, k, _sl: (b, 0, 0)),     # alpha
            ),
            scratch_shapes=[pltpu.VMEM((1, 1), jnp.float32),    # running max
                            pltpu.VMEM((1, 1), jnp.float32),    # running denom
                            pltpu.VMEM((1, kp), jnp.float32)],  # glimpse feat acc
        ),
        compiler_params=pltpu.CompilerParams(
            dimension_semantics=("parallel", "arbitrary"),
            vmem_limit_bytes=16 * 1024 * 1024),
    )(sl, spw3, hs_cat, cw, wvb)

    glimpse = glimpse3[:, 0, :]                                        # (B, en)
    alpha_new = jnp.transpose(alpha3[:, 0, :T], (1, 0))[:, :, None]    # (T, B, 1)
    return glimpse, alpha_new


content_based_attention = jax.jit(_forward)


# ----------------------------------------------------------------------------
# Pure-JAX reference (mirrors the PyTorch forward, f32 everywhere).
# ----------------------------------------------------------------------------
def content_attention_ref(sp, hs, alpha, seq_len, p):
    T, B, _ = hs.shape
    spw = sp @ p['W_w'].T + p['W_b']                                   # (B, en)
    hsv = hs @ p['V_w'].T + p['V_b']                                   # (T, B, en)
    a_bt = jnp.transpose(alpha[:, :, 0], (1, 0))                       # (B, T)
    a_padded = jnp.pad(a_bt, ((0, 0), (4, 4)))
    idx = jnp.arange(T)[:, None] + jnp.arange(9)[None, :]
    patches = a_padded[:, idx]                                         # (B, T, 9)
    f = jnp.einsum('btk,ck->btc', patches, p['F_w'][:, 0, :])          # Conv1d
    fu = jnp.transpose(f, (1, 0, 2)) @ p['U_w'].T + p['U_b']           # (T, B, en)
    c = jnp.tanh(spw[None] + hsv + fu)
    energy = c @ p['w_w'].T                                            # (T, B, 1)
    if seq_len is not None:
        m = (jnp.arange(T)[:, None] < jnp.asarray(seq_len)[None, :])[:, :, None]
        energy = jnp.where(m, energy, -jnp.inf)
    alpha_out = jax.nn.softmax(energy, axis=0)
    glimpse = jnp.sum(alpha_out * hsv, axis=0)
    return glimpse, alpha_out


# ----------------------------------------------------------------------------
if __name__ == "__main__":
    B, T = 2, 200
    hid_dim, feat_dim, en_dim = 32, 48, 256

    key = jax.random.PRNGKey(0)
    ks = jax.random.split(key, 10)
    params = dict(
        F_w=jax.random.normal(ks[0], (201, 1, 9), jnp.float32) * 0.1,
        W_w=jax.random.normal(ks[1], (en_dim, hid_dim), jnp.float32) * 0.1,
        W_b=jax.random.normal(ks[2], (en_dim,), jnp.float32) * 0.05,
        V_w=jax.random.normal(ks[3], (en_dim, feat_dim), jnp.float32) * 0.1,
        V_b=jax.random.normal(ks[4], (en_dim,), jnp.float32) * 0.05,
        U_w=jax.random.normal(ks[5], (en_dim, 201), jnp.float32) * 0.1,
        U_b=jax.random.normal(ks[6], (en_dim,), jnp.float32) * 0.05,
        w_w=jax.random.normal(ks[7], (1, en_dim), jnp.float32) * 0.1,
    )
    sp = jax.random.normal(ks[8], (B, hid_dim), jnp.float32)
    hs = jax.random.normal(ks[9], (T, B, feat_dim), jnp.float32)
    alpha0 = jax.nn.softmax(jnp.zeros((T, B, 1), jnp.float32), axis=0)  # uniform
    seq_len = jnp.array([200, 137], dtype=jnp.int32)

    glimpse, alpha_new = content_based_attention(sp, hs, alpha0, seq_len, params)
    glimpse = jax.block_until_ready(glimpse)
    alpha_new = jax.block_until_ready(alpha_new)

    g_ref, a_ref = content_attention_ref(sp, hs, alpha0, seq_len, params)

    assert glimpse.shape == (B, en_dim), glimpse.shape
    assert alpha_new.shape == (T, B, 1), alpha_new.shape
    assert np.all(np.isfinite(np.asarray(glimpse)))
    assert np.all(np.isfinite(np.asarray(alpha_new)))
    assert np.allclose(np.asarray(glimpse), np.asarray(g_ref),
                       atol=2e-2, rtol=2e-2), \
        float(np.max(np.abs(np.asarray(glimpse) - np.asarray(g_ref))))
    assert np.allclose(np.asarray(alpha_new), np.asarray(a_ref),
                       atol=1e-2, rtol=1e-2), \
        float(np.max(np.abs(np.asarray(alpha_new) - np.asarray(a_ref))))
    print("KERNEL_OK")
</pallas_src>

<mosaic_0001>
module attributes {stable_mosaic.version = 11 : i64} {
  func.func @kernel(%arg0: i32, %arg1: i32, %arg2: memref<2xi32, #tpu.memory_space<smem>>, %arg3: memref<1x1x256xf32, #tpu.memory_space<vmem>>, %arg4: memref<1x256x64xbf16, #tpu.memory_space<vmem>>, %arg5: memref<64x256xbf16, #tpu.memory_space<vmem>>, %arg6: memref<2x256xf32, #tpu.memory_space<vmem>>, %arg7: memref<1x1x256xf32, #tpu.memory_space<vmem>>, %arg8: memref<1x1x256xf32, #tpu.memory_space<vmem>>, %arg9: memref<1x1xf32, #tpu.memory_space<vmem>>, %arg10: memref<1x1xf32, #tpu.memory_space<vmem>>, %arg11: memref<1x64xf32, #tpu.memory_space<vmem>>) attributes {dimension_semantics = [#tpu.dimension_semantics<parallel>, #tpu.dimension_semantics<arbitrary>], iteration_bounds = array<i64: 2, 1>, scalar_prefetch = 1 : i64, scratch_operands = 3 : i64, tpu.core_type = #tpu.core_type<tc>, window_params = [{transform_indices = @transform_0, window_bounds = array<i64: 1, 1, 256>}, {transform_indices = @transform_1, window_bounds = array<i64: 1, 256, 64>}, {pipeline_mode = #tpu.pipeline_mode<synchronous>, transform_indices = @transform_2, window_bounds = array<i64: 64, 256>}, {pipeline_mode = #tpu.pipeline_mode<synchronous>, transform_indices = @transform_3, window_bounds = array<i64: 2, 256>}, {transform_indices = @transform_4, window_bounds = array<i64: 1, 1, 256>}, {transform_indices = @transform_5, window_bounds = array<i64: 1, 1, 256>}]} {
    %c0 = arith.constant 0 : index
    %c0_0 = arith.constant 0 : index
    %c0_1 = arith.constant 0 : index
    %0 = vector.load %arg4[%c0, %c0_0, %c0_1] : memref<1x256x64xbf16, #tpu.memory_space<vmem>>, vector<1x256x64xbf16>
    %1 = vector.shape_cast %0 : vector<1x256x64xbf16> to vector<256x64xbf16>
    %c0_2 = arith.constant 0 : index
    %c0_3 = arith.constant 0 : index
    %2 = vector.load %arg5[%c0_2, %c0_3] : memref<64x256xbf16, #tpu.memory_space<vmem>>, vector<64x256xbf16>
    %cst = arith.constant dense<0.000000e+00> : vector<256x256xf32>
    %3 = tpu.matmul %1, %2, %cst {dimension_numbers = #tpu.dot_dimension_numbers<[1], [0], [0], [1], [0, 0, 1, 1], [], []>} : vector<256x64xbf16>, vector<64x256xbf16>, vector<256x256xf32> -> vector<256x256xf32>
    %4 = vector.shape_cast %3 : vector<256x256xf32> to vector<1x256x256xf32>
    %c0_4 = arith.constant 0 : index
    %c0_5 = arith.constant 0 : index
    %c0_6 = arith.constant 0 : index
    %5 = vector.load %arg3[%c0_4, %c0_5, %c0_6] : memref<1x1x256xf32, #tpu.memory_space<vmem>>, vector<1x1x256xf32>
    %6 = vector.broadcast %5 : vector<1x1x256xf32> to vector<1x256x256xf32>
    %7 = arith.addf %4, %6 : vector<1x256x256xf32>
    %8 = math.tanh %7 : vector<1x256x256xf32>
    %c0_7 = arith.constant 0 : index
    %c0_8 = arith.constant 0 : index
    %9 = vector.load %arg6[%c0_7, %c0_8] : memref<2x256xf32, #tpu.memory_space<vmem>>, vector<1x256xf32>
    %10 = vector.shape_cast %9 : vector<1x256xf32> to vector<1x1x256xf32>
    %11 = vector.broadcast %10 : vector<1x1x256xf32> to vector<1x256x256xf32>
    %12 = arith.mulf %8, %11 : vector<1x256x256xf32>
    %cst_9 = arith.constant dense<0.000000e+00> : vector<1x256xf32>
    %13 = vector.multi_reduction <add>, %12, %cst_9 [2] : vector<1x256x256xf32> to vector<1x256xf32>
    %c256_i32 = arith.constant 256 : i32
    %14 = arith.muli %arg1, %c256_i32 : i32
    %15 = tpu.iota {dimensions = array<i32: 1>} : vector<1x256xi32>
    %16 = vector.broadcast %14 : i32 to vector<1x256xi32>
    %17 = arith.addi %16, %15 : vector<1x256xi32>
    %18 = arith.index_cast %arg0 : i32 to index
    %19 = memref.load %arg2[%18] : memref<2xi32, #tpu.memory_space<smem>>
    %20 = vector.broadcast %19 : i32 to vector<1x256xi32>
    %21 = arith.cmpi slt, %17, %20 : vector<1x256xi32>
    %c200_i32 = arith.constant 200 : i32
    %22 = vector.broadcast %c200_i32 : i32 to vector<1x256xi32>
    %23 = arith.cmpi slt, %17, %22 : vector<1x256xi32>
    %24 = arith.andi %21, %23 : vector<1x256xi1>
    %cst_10 = arith.constant -1.000000e+30 : f32
    %25 = vector.broadcast %cst_10 : f32 to vector<1x256xf32>
    %26 = arith.select %24, %13, %25 : vector<1x256xi1>, vector<1x256xf32>
    %cst_11 = arith.constant dense<0xFF800000> : vector<1xf32>
    %27 = vector.multi_reduction <maximumf>, %26, %cst_11 [1] : vector<1x256xf32> to vector<1xf32>
    %28 = vector.shape_cast %27 : vector<1xf32> to vector<1x1xf32>
    %29 = vector.broadcast %28 : vector<1x1xf32> to vector<1x256xf32>
    %30 = arith.subf %26, %29 : vector<1x256xf32>
    %31 = math.exp %30 : vector<1x256xf32>
    %32 = arith.extui %24 : vector<1x256xi1> to vector<1x256xi32>
    %33 = arith.sitofp %32 : vector<1x256xi32> to vector<1x256xf32>
    %34 = arith.mulf %31, %33 : vector<1x256xf32>
    %cst_12 = arith.constant dense<0.000000e+00> : vector<1xf32>
    %35 = vector.multi_reduction <add>, %34, %cst_12 [1] : vector<1x256xf32> to vector<1xf32>
    %36 = vector.shape_cast %35 : vector<1xf32> to vector<1x1xf32>
    %37 = arith.truncf %34 : vector<1x256xf32> to vector<1x256xbf16>
    %cst_13 = arith.constant dense<0.000000e+00> : vector<1x64xf32>
    %38 = tpu.matmul %37, %1, %cst_13 {dimension_numbers = #tpu.dot_dimension_numbers<[1], [0], [0], [1], [0, 0, 1, 1], [], []>} : vector<1x256xbf16>, vector<256x64xbf16>, vector<1x64xf32> -> vector<1x64xf32>
    %39 = tpu.reciprocal %36 {approx = true} : vector<1x1xf32> -> vector<1x1xf32>
    %40 = vector.broadcast %39 : vector<1x1xf32> to vector<1x256xf32>
    %41 = arith.mulf %34, %40 : vector<1x256xf32>
    %42 = vector.shape_cast %41 : vector<1x256xf32> to vector<1x1x256xf32>
    %c0_14 = arith.constant 0 : index
    %c0_15 = arith.constant 0 : index
    %c0_16 = arith.constant 0 : index
    %43 = vector.load %arg8[%c0_14, %c0_15, %c0_16] : memref<1x1x256xf32, #tpu.memory_space<vmem>>, vector<1x1x256xf32>
    tpu.vector_store %arg8[%c0_14, %c0_15, %c0_16], %42 {strides = array<i32>} : memref<1x1x256xf32, #tpu.memory_space<vmem>>, vector<1x1x256xf32>,
    %44 = vector.broadcast %39 : vector<1x1xf32> to vector<1x64xf32>
    %45 = arith.mulf %38, %44 : vector<1x64xf32>
    %46 = vector.extract_strided_slice %45 {offsets = [0, 0], sizes = [1, 48], strides = [1, 1]} : vector<1x64xf32> to vector<1x48xf32>
    %47 = arith.truncf %46 : vector<1x48xf32> to vector<1x48xbf16>
    %c0_17 = arith.constant 0 : index
    %c0_18 = arith.constant 0 : index
    %48 = vector.load %arg5[%c0_17, %c0_18] : memref<64x256xbf16, #tpu.memory_space<vmem>>, vector<48x256xbf16>
    %cst_19 = arith.constant dense<0.000000e+00> : vector<1x256xf32>
    %49 = tpu.matmul %47, %48, %cst_19 {dimension_numbers = #tpu.dot_dimension_numbers<[1], [0], [0], [1], [0, 0, 1, 1], [], []>} : vector<1x48xbf16>, vector<48x256xbf16>, vector<1x256xf32> -> vector<1x256xf32>
    %c1 = arith.constant 1 : index
    %c0_20 = arith.constant 0 : index
    %50 = vector.load %arg6[%c1, %c0_20] : memref<2x256xf32, #tpu.memory_space<vmem>>, vector<1x256xf32>
    %51 = arith.addf %49, %50 : vector<1x256xf32>
    %52 = vector.shape_cast %51 : vector<1x256xf32> to vector<1x1x256xf32>
    %c0_21 = arith.constant 0 : index
    %c0_22 = arith.constant 0 : index
    %c0_23 = arith.constant 0 : index
    %53 = vector.load %arg7[%c0_21, %c0_22, %c0_23] : memref<1x1x256xf32, #tpu.memory_space<vmem>>, vector<1x1x256xf32>
    tpu.vector_store %arg7[%c0_21, %c0_22, %c0_23], %52 {strides = array<i32>} : memref<1x1x256xf32, #tpu.memory_space<vmem>>, vector<1x1x256xf32>,
    return
  }
  func.func @transform_0(%arg0: i32, %arg1: i32, %arg2: memref<2xi32, #tpu.memory_space<smem>>) -> (i32, i32, i32) {
    %c0_i32 = arith.constant 0 : i32
    %c0_i32_0 = arith.constant 0 : i32
    %c0_i32_1 = arith.constant 0 : i32
    return %arg0, %c0_i32, %c0_i32_0 : i32, i32, i32
  }
  func.func @transform_1(%arg0: i32, %arg1: i32, %arg2: memref<2xi32, #tpu.memory_space<smem>>) -> (i32, i32, i32) {
    %c0_i32 = arith.constant 0 : i32
    %c0_i32_0 = arith.constant 0 : i32
    return %arg0, %arg1, %c0_i32 : i32, i32, i32
  }
  func.func @transform_2(%arg0: i32, %arg1: i32, %arg2: memref<2xi32, #tpu.memory_space<smem>>) -> (i32, i32) {
    %c0_i32 = arith.constant 0 : i32
    %c0_i32_0 = arith.constant 0 : i32
    %c0_i32_1 = arith.constant 0 : i32
    return %c0_i32, %c0_i32_0 : i32, i32
  }
  func.func @transform_3(%arg0: i32, %arg1: i32, %arg2: memref<2xi32, #tpu.memory_space<smem>>) -> (i32, i32) {
    %c0_i32 = arith.constant 0 : i32
    %c0_i32_0 = arith.constant 0 : i32
    %c0_i32_1 = arith.constant 0 : i32
    return %c0_i32, %c0_i32_0 : i32, i32
  }
  func.func @transform_4(%arg0: i32, %arg1: i32, %arg2: memref<2xi32, #tpu.memory_space<smem>>) -> (i32, i32, i32) {
    %c0_i32 = arith.constant 0 : i32
    %c0_i32_0 = arith.constant 0 : i32
    %c0_i32_1 = arith.constant 0 : i32
    return %arg0, %c0_i32, %c0_i32_0 : i32, i32, i32
  }
  func.func @transform_5(%arg0: i32, %arg1: i32, %arg2: memref<2xi32, #tpu.memory_space<smem>>) -> (i32, i32, i32) {
    %c0_i32 = arith.constant 0 : i32
    %c0_i32_0 = arith.constant 0 : i32
    %c0_i32_1 = arith.constant 0 : i32
    return %arg0, %c0_i32, %c0_i32_0 : i32, i32, i32
  }
}

</mosaic_0001>

<bundles_post_ra>
// kernel: _forward.1
= control target key start
LH: loop header
LB: loop body
LE: loop exit
PB: predicated region body
PF: predicated region fallthrough
CT: control target
= control target key end

     0   :  { %s2492_s0 = inlined_call_operand.vmem [shape: s32[2], index: 0, kind: input, shape index: {}]   ;;  %s2493_s1 = inlined_call_operand.vmem [shape: f32[2,1,256], index: 1, kind: input, shape index: {}]   ;;  %s2494_s2 = inlined_call_operand.vmem [shape: bf16[2,256,64], index: 2, kind: input, shape index: {}]   ;;  %s2495_s3 = inlined_call_operand.vmem [shape: bf16[64,256], index: 3, kind: input, shape index: {}]   ;;  %s2496_s4 = inlined_call_operand.vmem [shape: f32[2,256], index: 4, kind: input, shape index: {}]   ;;  %s2497_s5 = inlined_call_operand.vmem [shape: f32[2,1,256], index: 5, kind: output, shape index: {0}]   ;;  %s2498_s6 = inlined_call_operand.vmem [shape: f32[2,1,256], index: 6, kind: output, shape index: {1}]  }
   0x1   :  { %s12_s23 = sshll.u32 %s2492_s0, 4  ;;  %s13_s23 = int_to_ptr.vmem [resolvable:$true] %s12_s23 }
   0x2   :  { %s1864_s24 = scalar_lea.vmem %s13_s23, 16  ;;  %p1869_p1 = scmp.lt.s32.totalorder %s13_s23, %s13_s23 }
   0x3   :  { %p1865_p0 = scmp.ne.s32.totalorder %s13_s23, %s1864_s24  ;;  %p1870_p2 = scmp.lt.s32.totalorder %s1864_s24, %s1864_s24 }
   0x5   :  { %p1871_p3 = por %p1870_p2, %p1869_p1 }
   0x7   :  { %p1872_p4 = pnand %p1871_p3, %p1865_p0 }
   0x9   :  { %1875 = shalt.err (!%p1872_p4)  }
   0xa   :  { %s1902_s25 = smov [#allocation6]  }
   0xb   :  { %15 = dma.vmem_to_smem %s13_s23, 16, %s1902_s25, [#allocation5] }
   0xc   :  { %1888 = dma.done.wait [#allocation5], 16 }
   0xd   :  { %1889 = vsyncadd [#allocation5], 4294967280 }
   0xe   :  { %17 = sfence }
   0xf   :  { %s1944_s26 = smov 0   ;;  %s1946_s27 = smov 0  }
  0x10   :  { %s1948_s28 = smov 0  }
  0x11 LB: > { %s35_s0 = sadd.s32 1, %s1896_s27  ;;  %p1576_p5 = scmp.ge.s32.totalorder %s1900_s28, 1  ;;  %s1900_s28 = sphi %s1948_s28, %s23_s28   ;;  %s1896_s27 = sphi %s1946_s27, %s2506_s27   ;;  %s1892_s26 = sphi %s1944_s26, %s2505_s26  }
  0x12   : > { %p37_p6 = scmp.ge.s32.totalorder %s35_s0, 2  ;;  %p225_p7 = scmp.lt.s32.totalorder %s1900_s28, 3 }
  0x14   : > { %s2508_s0 = smov (%p37_p6, %s35_s0), 0  ;;  %p226_p8 = pnand %p1576_p5, %p225_p7 }
  0x15   : > { %v1693_v0 = vld [vmem:[%s2495_s3 + $0x4] ss:$8 sps:$4 sm:$0xff] (!%p226_p8)   ;;  %p264_p9 = scmp.lt.s32.totalorder (!%p226_p8), %s1892_s26, 1  ;;  %v1695_v1 = vld [vmem:[%s2495_s3] ss:$8 sps:$4 sm:$0xff] (!%p226_p8)   ;;  %v1903_v2 = vmov (!%p226_p8), 0   ;;  %v691_v25 = vlaneseq (!%p226_p8) }
  0x16   : > { %229 = sbr.rel (%p226_p8) target bundleno = 1110 (0x456), region = 36  ;;  %528 = vmatprep.mubr.bf16.mxu0 (!%p226_p8), %v1903_v2  ;;  %628 = vmatprep.mubr.bf16.mxu1 (!%p226_p8), %v1903_v2  ;;  %v1696_v3 = vld [vmem:[%s2495_s3 + $0x14] ss:$8 sps:$4 sm:$0xff] (!%p226_p8)   ;;  %v1698_v4 = vld [vmem:[%s2495_s3 + $0x10] ss:$8 sps:$4 sm:$0xff] (!%p226_p8)   ;;  %vm447_vm0 = vcmask (!%p226_p8), 523264  }
  0x17   : > { %496 = vmatprep.subr.bf16.mxu0 (!%p226_p8), %v1693_v0  ;;  %1657 = vmatprep.subr.bf16.mxu1 (!%p226_p8), %v1693_v0  ;;  %v1699_v5 = vld [vmem:[%s2495_s3 + $0x24] ss:$8 sps:$4 sm:$0xff] (!%p226_p8)   ;;  %v1701_v6 = vld [vmem:[%s2495_s3 + $0x20] ss:$8 sps:$4 sm:$0xff] (!%p226_p8)   ;;  %v1702_v7 = vld [vmem:[%s2495_s3 + $0x34] ss:$8 sps:$4 sm:$0xff] (!%p226_p8)  }
  0x18   : > { %497 = vmatpush1.bf16.msra.mxu0 (!%p226_p8), %v1695_v1  ;;  %1661 = vmatpush1.bf16.msra.mxu1 (!%p226_p8), %v1695_v1  ;;  %v1704_v8 = vld [vmem:[%s2495_s3 + $0x30] ss:$8 sps:$4 sm:$0xff] (!%p226_p8)   ;;  %v2050_v26 = vshrl.u32 (!%p226_p8), %v691_v25, 7  ;;  %v829_v48 = vld [vmem:[%s2496_s4] ss:$2 sm:$0x3] (!%p226_p8) }
  0x19   : > { %498 = vmatprep.subr.bf16.mxu0 (!%p226_p8), %v1696_v3  ;;  %1658 = vmatprep.subr.bf16.mxu1 (!%p226_p8), %v1696_v3  ;;  %vm1057_vm1 = vcmask (!%p226_p8), 130112   ;;  %vm1064_vm2 = vcmask (!%p226_p8), 195712   ;;  %vm1071_vm3 = vcmask (!%p226_p8), 261312   ;;  %vm1078_vm4 = vcmask (!%p226_p8), 326912  }
  0x1a   : > { %v2057_v27 = vsub.s32 (!%p226_p8), 0, %v2050_v26  ;;  %v2060_v29 = vsub.s32 (!%p226_p8), 1, %v2050_v26  ;;  %vm1085_vm5 = vcmask (!%p226_p8), 392512   ;;  %vm1092_vm6 = vcmask (!%p226_p8), 458112  }
  0x1b   : > { %vm1099_vm7 = vcmask (!%p226_p8), 523712   ;;  %vm1106_vm8 = vcmask (!%p226_p8), 589312   ;;  %vm1113_vm9 = vcmask (!%p226_p8), 654912   ;;  %vm1120_vm10 = vcmask (!%p226_p8), 720512  }
  0x1c   : > { %499 = vmatpush1.bf16.msra.mxu0 (!%p226_p8), %v1698_v4  ;;  %1662 = vmatpush1.bf16.msra.mxu1 (!%p226_p8), %v1698_v4  ;;  %v2082_v56 = vrot.slane (!%p226_p8), %v829_v48, %v2057_v27  ;;  %v2086_v60 = vrot.slane (!%p226_p8), %v829_v48, %v2060_v29  ;;  %vm1127_vm11 = vcmask (!%p226_p8), 786112   ;;  %vm1134_vm12 = vcmask (!%p226_p8), 851712  }
  0x1d   : > { %s1977_s11 = scalar_select %p264_p9, %s1892_s26, 1  ;;  %500 = vmatprep.subr.bf16.mxu0 %v1699_v5  ;;  %1659 = vmatprep.subr.bf16.mxu1 %v1699_v5  ;;  %vm1141_vm13 = vcmask 917312   ;;  %vm1148_vm14 = vcmask 982912   ;;  %vm1155_vm15 = vcmask 1048512  }
  0x1f   : > { %s1634_s16 = sshll.u32 %s1977_s11, 7  ;;  %s2047_s29 = sshll.u32 %s1977_s11, 1 }
  0x20   : > { %s1989_s19 = scalar_lea.vmem %s2494_s2, %s1634_s16  ;;  %501 = vmatpush1.bf16.msra.mxu0 %v1701_v6  ;;  %1663 = vmatpush1.bf16.msra.mxu1 %v1701_v6  ;;  %s267_s8 = scalar_lea.vmem %s2493_s1, %s2047_s29 }
  0x21   : > { %502 = vmatprep.subr.bf16.mxu0 %v1702_v7  ;;  %1660 = vmatprep.subr.bf16.mxu1 %v1702_v7  ;;  %v1705_v9 = vld [vmem:[%s1989_s19] sm:$0xff]   ;;  %v1708_v10 = vld [vmem:[%s1989_s19 + $0x50] sm:$0xff]   ;;  %v1706_v11 = vld [vmem:[%s1989_s19 + $0x8] sm:$0xff]   ;;  %s2303_s11 = sld [smem:[#allocation6 + %s1892_s26]]  ;;  %s285_s25 = scalar_lea.vmem %s2498_s6, %s2047_s29 }
  0x22   : > { %v1718_v12 = vld [vmem:[%s1989_s19 + $0x40] sm:$0xff]   ;;  %v1710_v13 = vld [vmem:[%s1989_s19 + $0x58] sm:$0xff]   ;;  %v1719_v14 = vld [vmem:[%s1989_s19 + $0x48] sm:$0xff]   ;;  %s281_s10 = scalar_lea.vmem %s2497_s5, %s2047_s29 }
  0x23   : > { %v1707_v15 = vld [vmem:[%s1989_s19 + $0x10] sm:$0xff]   ;;  %v1712_v16 = vld [vmem:[%s1989_s19 + $0x60] sm:$0xff]   ;;  %v1709_v17 = vld [vmem:[%s1989_s19 + $0x18] sm:$0xff]  }
  0x24   : > { %503 = vmatpush1.bf16.msra.mxu0 %v1704_v8  ;;  %1664 = vmatpush1.bf16.msra.mxu1 %v1704_v8  ;;  %v1711_v18 = vld [vmem:[%s1989_s19 + $0x20] sm:$0xff]   ;;  %v1714_v19 = vld [vmem:[%s1989_s19 + $0x68] sm:$0xff]   ;;  %v1717_v21 = vld [vmem:[%s1989_s19 + $0x70] sm:$0xff]  }
  0x25   : > { %1635 = vmatprep.subr.bf16.mxu1 %v1718_v12  ;;  %v1713_v20 = vld [vmem:[%s1989_s19 + $0x28] sm:$0xff]   ;;  %v1715_v22 = vld [vmem:[%s1989_s19 + $0x30] sm:$0xff]   ;;  %v1720_v23 = vld [vmem:[%s1989_s19 + $0x78] sm:$0xff]  }
  0x26   : > { %v1716_v24 = vld [vmem:[%s1989_s19 + $0x38] sm:$0xff]   ;;  %v689_v28 = vld [vmem:[%s267_s8] sm:$0x3] }
  0x27   : > { %1606 = vmatmul.mubr.msk.bf16.vlgmr.msra.gmra.mrb[0].mxu0 %vm447_vm0, %v1705_v9  ;;  %1616 = vmatmul.mubr.msk.bf16.vlgmr.msra.gmra.mrb[0].mxu1 %vm447_vm0, %v1708_v10  ;;  %v2063_v30 = vrot.slane %v689_v28, %v2057_v27  ;;  %v2066_v31 = vrot.slane %v689_v28, %v2060_v29 }
  0x28   : > { %538 = vmatprep.mubr.bf16.mxu0 %v1903_v2  ;;  %638 = vmatprep.mubr.bf16.mxu1 %v1903_v2 }
  0x29   : > { %1636 = vmatpush3.bf16.msra.mxu1 %v1705_v9 }
  0x2a   : > { %1637 = vmatprep.subr.bf16.mxu1 %v1719_v14 }
  0x2d   : > { %1638 = vmatpush3.bf16.msra.mxu1 %v1706_v11 }
  0x2e   : > { %1639 = vmatprep.subr.bf16.mxu1 %v1708_v10 }
  0x2f   : > { %1607 = vmatmul.mubr.msk.bf16.gmra.mrb[4].mxu0 %vm447_vm0, %v1706_v11  ;;  %1617 = vmatmul.mubr.msk.bf16.gmra.mrb[4].mxu1 %vm447_vm0, %v1710_v13 }
  0x30   : > { %548 = vmatprep.mubr.bf16.mxu0 %v1903_v2  ;;  %648 = vmatprep.mubr.bf16.mxu1 %v1903_v2 }
  0x31   : > { %1640 = vmatpush3.bf16.msra.mxu1 %v1707_v15 }
  0x32   : > { %1641 = vmatprep.subr.bf16.mxu1 %v1710_v13 }
  0x35   : > { %1642 = vmatpush3.bf16.msra.mxu1 %v1709_v17 }
  0x36   : > { %1643 = vmatprep.subr.bf16.mxu1 %v1712_v16 }
  0x37   : > { %1608 = vmatmul.mubr.msk.bf16.gmra.mrb[8].mxu0 %vm447_vm0, %v1707_v15  ;;  %1618 = vmatmul.mubr.msk.bf16.gmra.mrb[8].mxu1 %vm447_vm0, %v1712_v16 }
  0x38   : > { %558 = vmatprep.mubr.bf16.mxu0 %v1903_v2  ;;  %658 = vmatprep.mubr.bf16.mxu1 %v1903_v2 }
  0x39   : > { %1644 = vmatpush3.bf16.msra.mxu1 %v1711_v18 }
  0x3a   : > { %1645 = vmatprep.subr.bf16.mxu1 %v1714_v19 }
  0x3d   : > { %1646 = vmatpush3.bf16.msra.mxu1 %v1713_v20 }
  0x3e   : > { %1647 = vmatprep.subr.bf16.mxu1 %v1717_v21 }
  0x3f   : > { %1609 = vmatmul.mubr.msk.bf16.gmra.mrb[12].mxu0 %vm447_vm0, %v1709_v17  ;;  %1619 = vmatmul.mubr.msk.bf16.gmra.mrb[12].mxu1 %vm447_vm0, %v1714_v19 }
  0x40   : > { %568 = vmatprep.mubr.bf16.mxu0 %v1903_v2  ;;  %668 = vmatprep.mubr.bf16.mxu1 %v1903_v2 }
  0x41   : > { %1648 = vmatpush3.bf16.msra.mxu1 %v1715_v22 }
  0x42   : > { %1649 = vmatprep.subr.bf16.mxu1 %v1720_v23 }
  0x45   : > { %1650 = vmatpush3.bf16.msra.mxu1 %v1716_v24 }
  0x47   : > { %1610 = vmatmul.mubr.msk.bf16.gmra.mrb[16].mxu0 %vm447_vm0, %v1711_v18  ;;  %1620 = vmatmul.mubr.msk.bf16.gmra.mrb[16].mxu1 %vm447_vm0, %v1717_v21 }
  0x48   : > { %578 = vmatprep.mubr.bf16.mxu0 %v1903_v2  ;;  %678 = vmatprep.mubr.bf16.mxu1 %v1903_v2 }
  0x4f   : > { %1611 = vmatmul.mubr.msk.bf16.gmra.mrb[20].mxu0 %vm447_vm0, %v1713_v20  ;;  %1621 = vmatmul.mubr.msk.bf16.gmra.mrb[20].mxu1 %vm447_vm0, %v1720_v23 }
  0x50   : > { %588 = vmatprep.mubr.bf16.mxu0 %v1903_v2 }
  0x57   : > { %1612 = vmatmul.mubr.msk.bf16.gmra.mrb[24].mxu0 %vm447_vm0, %v1715_v22 }
  0x58   : > { %598 = vmatprep.mubr.bf16.mxu0 %v1903_v2 }
  0x5f   : > { %1613 = vmatmul.mubr.msk.bf16.gmra.mrb[28].mxu0 %vm447_vm0, %v1716_v24 }
  0x60   : > { %608 = vmatprep.mubr.bf16.mxu0 %v1903_v2 }
  0x67   : > { %1614 = vmatmul.mubr.msk.bf16.gmra.mrb[32].mxu0 %vm447_vm0, %v1718_v12 }
  0x68   : > { %618 = vmatprep.mubr.bf16.mxu0 %v1903_v2 }
  0x6f   : > { %1615 = vmatmul.mubr.msk.bf16.gmra.mrb[36].mxu0 %vm447_vm0, %v1719_v14 }
  0xfa   : > { %v530_v32 = vpop.f32.mrb[0].mxu0  ;;  %v630_v33 = vpop.f32.mrb[0].mxu1 }
  0xfb   : > { %v701_v34 = vadd.f32 %v2063_v30, %v530_v32  ;;  %v532_v35 = vpop.f32.mrb[1].mxu0  ;;  %v632_v36 = vpop.f32.mrb[1].mxu1  ;;  %v741_v42 = vadd.f32 %v2063_v30, %v630_v33 }
  0xfc   : > { %v702_v37 = vadd.f32 %v2066_v31, %v532_v35  ;;  %v534_v38 = vpop.f32.mrb[2].mxu0  ;;  %v634_v39 = vpop.f32.mrb[2].mxu1  ;;  %v742_v45 = vadd.f32 %v2066_v31, %v632_v36 }
  0xfd   : > { %1730 = vtanh.f32 %v701_v34  ;;  %v703_v40 = vadd.f32 %v2063_v30, %v534_v38  ;;  %v536_v41 = vpop.f32.mrb[3].mxu0  ;;  %v636_v43 = vpop.f32.mrb[3].mxu1  ;;  %v743_v46 = vadd.f32 %v2063_v30, %v634_v39 }
  0xfe   : > { %1732 = vtanh.f32 %v702_v37  ;;  %v704_v44 = vadd.f32 %v2066_v31, %v536_v41  ;;  %v744_v47 = vadd.f32 %v2066_v31, %v636_v43 }
  0xff   : > { %1734 = vtanh.f32 %v703_v40 }
 0x100   : > { %1736 = vtanh.f32 %v704_v44 }
 0x101   : > { %1738 = vtanh.f32 %v741_v42 }
 0x102   : > { %v540_v49 = vpop.f32.mrb[4].mxu0  ;;  %1740 = vtanh.f32 %v742_v45  ;;  %v640_v50 = vpop.f32.mrb[4].mxu1 }
 0x103   : > { %v705_v51 = vadd.f32 %v2063_v30, %v540_v49  ;;  %v542_v52 = vpop.f32.mrb[5].mxu0  ;;  %1742 = vtanh.f32 %v743_v46  ;;  %v642_v53 = vpop.f32.mrb[5].mxu1  ;;  %v745_v61 = vadd.f32 %v2063_v30, %v640_v50 }
 0x104   : > { %v706_v54 = vadd.f32 %v2066_v31, %v542_v52  ;;  %v544_v55 = vpop.f32.mrb[6].mxu0  ;;  %1744 = vtanh.f32 %v744_v47  ;;  %v644_v57 = vpop.f32.mrb[6].mxu1  ;;  %v746_v0 = vadd.f32 %v2066_v31, %v642_v53 }
 0x105   : > { %1746 = vtanh.f32 %v705_v51  ;;  %v707_v58 = vadd.f32 %v2063_v30, %v544_v55  ;;  %v546_v59 = vpop.f32.mrb[7].mxu0  ;;  %v646_v62 = vpop.f32.mrb[7].mxu1  ;;  %v747_v3 = vadd.f32 %v2063_v30, %v644_v57 }
 0x106   : > { %1748 = vtanh.f32 %v706_v54  ;;  %v708_v63 = vadd.f32 %v2066_v31, %v546_v59  ;;  %v748_v6 = vadd.f32 %v2066_v31, %v646_v62 }
 0x107   : > { %v1731_v1 = vpop.eup %1730  ;;  %1750 = vtanh.f32 %v707_v58 }
 0x108   : > { %v1733_v4 = vpop.eup %1732  ;;  %1752 = vtanh.f32 %v708_v63  ;;  %v841_v5 = vmul.f32 %v1731_v1, %v2082_v56 }
 0x109   : > { %v1735_v7 = vpop.eup %1734  ;;  %v842_v8 = vmul.f32 %v1733_v4, %v2086_v60  ;;  %1754 = vtanh.f32 %v745_v61 }
 0x10a   : > { %v1737_v9 = vpop.eup %1736  ;;  %v550_v10 = vpop.f32.mrb[8].mxu0  ;;  %v843_v11 = vmul.f32 %v1735_v7, %v2082_v56  ;;  %1756 = vtanh.f32 %v746_v0 }
 0x10b   : > { %v650_v12 = vpop.f32.mrb[8].mxu1  ;;  %v1739_v13 = vpop.eup %1738  ;;  %v709_v14 = vadd.f32 %v2063_v30, %v550_v10  ;;  %v905_v16 = vadd.f32 %v842_v8, %v841_v5  ;;  %v844_v17 = vmul.f32 %v1737_v9, %v2086_v60  ;;  %1758 = vtanh.f32 %v747_v3 }
 0x10c   : > { %v552_v15 = vpop.f32.mrb[9].mxu0  ;;  %v652_v18 = vpop.f32.mrb[9].mxu1  ;;  %1760 = vtanh.f32 %v748_v6  ;;  %v749_v22 = vadd.f32 %v2063_v30, %v650_v12  ;;  %v881_v34 = vmul.f32 %v1739_v13, %v2082_v56 }
 0x10d   : > { %v1741_v19 = vpop.eup %1740  ;;  %v710_v20 = vadd.f32 %v2066_v31, %v552_v15  ;;  %v554_v21 = vpop.f32.mrb[10].mxu0  ;;  %1762 = vtanh.f32 %v709_v14  ;;  %906 = vadd.xlane.f32.xlu0 %v905_v16  ;;  %v908_v33 = vadd.f32 %v844_v17, %v843_v11  ;;  %v750_v38 = vadd.f32 %v2066_v31, %v652_v18 }
 0x10e   : > { %v654_v23 = vpop.f32.mrb[10].mxu1  ;;  %v1743_v24 = vpop.eup %1742  ;;  %v711_v28 = vadd.f32 %v2063_v30, %v554_v21  ;;  %v882_v39 = vmul.f32 %v1741_v19, %v2086_v60 }
 0x10f   : > { %v556_v32 = vpop.f32.mrb[11].mxu0  ;;  %v656_v35 = vpop.f32.mrb[11].mxu1  ;;  %1764 = vtanh.f32 %v710_v20  ;;  %v751_v41 = vadd.f32 %v2063_v30, %v654_v23  ;;  %v883_v42 = vmul.f32 %v1743_v24, %v2082_v56 }
 0x110   : > { %v1745_v36 = vpop.eup %1744  ;;  %v712_v37 = vadd.f32 %v2066_v31, %v556_v32  ;;  %1766 = vtanh.f32 %v711_v28  ;;  %v965_v46 = vadd.f32 %v882_v39, %v881_v34  ;;  %v752_v47 = vadd.f32 %v2066_v31, %v656_v35 }
 0x111   : > { %v1747_v40 = vpop.eup %1746  ;;  %v884_v43 = vmul.f32 %v1745_v36, %v2086_v60  ;;  %909 = vadd.xlane.f32.xlu0 %v908_v33 }
 0x112   : > { %v1749_v44 = vpop.eup %1748  ;;  %1768 = vtanh.f32 %v712_v37  ;;  %v845_v45 = vmul.f32 %v1747_v40, %v2082_v56  ;;  %v560_v52 = vpop.f32.mrb[12].mxu0  ;;  %966 = vadd.xlane.f32.xlu1 %v965_v46 }
 0x113   : > { %v1751_v48 = vpop.eup %1750  ;;  %v846_v49 = vmul.f32 %v1749_v44, %v2086_v60  ;;  %1770 = vtanh.f32 %v749_v22  ;;  %v968_v50 = vadd.f32 %v884_v43, %v883_v42  ;;  %v660_v54 = vpop.f32.mrb[12].mxu1  ;;  %v713_v57 = vadd.f32 %v2063_v30, %v560_v52 }
 0x114   : > { %v1753_v51 = vpop.eup %1752  ;;  %v847_v53 = vmul.f32 %v1751_v48, %v2082_v56  ;;  %1772 = vtanh.f32 %v750_v38  ;;  %v562_v58 = vpop.f32.mrb[13].mxu0  ;;  %v753_v3 = vadd.f32 %v2063_v30, %v660_v54 }
 0x115   : > { %v1755_v55 = vpop.eup %1754  ;;  %v911_v59 = vadd.f32 %v846_v49, %v845_v45  ;;  %v848_v61 = vmul.f32 %v1753_v51, %v2086_v60  ;;  %1774 = vtanh.f32 %v751_v41  ;;  %v662_v62 = vpop.f32.mrb[13].mxu1  ;;  %v714_v0 = vadd.f32 %v2066_v31, %v562_v58 }
 0x116   : > { %v1757_v63 = vpop.eup %1756  ;;  %v564_v1 = vpop.f32.mrb[14].mxu0  ;;  %1776 = vtanh.f32 %v752_v47  ;;  %v885_v9 = vmul.f32 %v1755_v55, %v2082_v56  ;;  %969 = vadd.xlane.f32.xlu1 %v968_v50  ;;  %v754_v13 = vadd.f32 %v2066_v31, %v662_v62 }
 0x117   : > { %v664_v4 = vpop.f32.mrb[14].mxu1  ;;  %v1759_v5 = vpop.eup %1758  ;;  %1778 = vtanh.f32 %v713_v57  ;;  %v715_v6 = vadd.f32 %v2063_v30, %v564_v1  ;;  %912 = vadd.xlane.f32.xlu0 %v911_v59  ;;  %v914_v8 = vadd.f32 %v848_v61, %v847_v53  ;;  %v886_v14 = vmul.f32 %v1757_v63, %v2086_v60 }
 0x118   : > { %v566_v7 = vpop.f32.mrb[15].mxu0  ;;  %v666_v10 = vpop.f32.mrb[15].mxu1  ;;  %1780 = vtanh.f32 %v714_v0  ;;  %v755_v16 = vadd.f32 %v2063_v30, %v664_v4  ;;  %v887_v17 = vmul.f32 %v1759_v5, %v2082_v56 }
 0x119   : > { %v1761_v11 = vpop.eup %1760  ;;  %v716_v12 = vadd.f32 %v2066_v31, %v566_v7  ;;  %1782 = vtanh.f32 %v715_v6  ;;  %v971_v21 = vadd.f32 %v886_v14, %v885_v9  ;;  %v756_v22 = vadd.f32 %v2066_v31, %v666_v10 }
 0x11a   : > { %v1763_v15 = vpop.eup %1762  ;;  %v888_v18 = vmul.f32 %v1761_v11, %v2086_v60  ;;  %v570_v33 = vpop.f32.mrb[16].mxu0 }
 0x11b   : > { %v1765_v19 = vpop.eup %1764  ;;  %1784 = vtanh.f32 %v716_v12  ;;  %v849_v20 = vmul.f32 %v1763_v15, %v2082_v56  ;;  %915 = vadd.xlane.f32.xlu0 %v914_v8  ;;  %972 = vadd.xlane.f32.xlu1 %v971_v21  ;;  %v670_v35 = vpop.f32.mrb[16].mxu1  ;;  %v717_v37 = vadd.f32 %v2063_v30, %v570_v33 }
 0x11c   : > { %v1767_v23 = vpop.eup %1766  ;;  %v850_v24 = vmul.f32 %v1765_v19, %v2086_v60  ;;  %1786 = vtanh.f32 %v753_v3  ;;  %v974_v28 = vadd.f32 %v888_v18, %v887_v17  ;;  %v572_v38 = vpop.f32.mrb[17].mxu0  ;;  %v757_v45 = vadd.f32 %v2063_v30, %v670_v35 }
 0x11d   : > { %v1769_v32 = vpop.eup %1768  ;;  %v851_v34 = vmul.f32 %v1767_v23, %v2082_v56  ;;  %1788 = vtanh.f32 %v754_v13  ;;  %v672_v41 = vpop.f32.mrb[17].mxu1  ;;  %v718_v43 = vadd.f32 %v2066_v31, %v572_v38 }
 0x11e   : > { %v1771_v36 = vpop.eup %1770  ;;  %v917_v39 = vadd.f32 %v850_v24, %v849_v20  ;;  %v852_v40 = vmul.f32 %v1769_v32, %v2086_v60  ;;  %1790 = vtanh.f32 %v755_v16  ;;  %v574_v44 = vpop.f32.mrb[18].mxu0  ;;  %v758_v55 = vadd.f32 %v2066_v31, %v672_v41 }
 0x11f   : > { %v1773_v42 = vpop.eup %1772  ;;  %1792 = vtanh.f32 %v756_v22  ;;  %v674_v46 = vpop.f32.mrb[18].mxu1  ;;  %v719_v48 = vadd.f32 %v2063_v30, %v574_v44  ;;  %v889_v51 = vmul.f32 %v1771_v36, %v2082_v56  ;;  %975 = vadd.xlane.f32.xlu1 %v974_v28 }
 0x120   : > { %v1775_v47 = vpop.eup %1774  ;;  %1794 = vtanh.f32 %v717_v37  ;;  %v576_v49 = vpop.f32.mrb[19].mxu0  ;;  %918 = vadd.xlane.f32.xlu0 %v917_v39  ;;  %v920_v50 = vadd.f32 %v852_v40, %v851_v34  ;;  %v890_v57 = vmul.f32 %v1773_v42, %v2086_v60  ;;  %v759_v59 = vadd.f32 %v2063_v30, %v674_v46 }
 0x121   : > { %v676_v52 = vpop.f32.mrb[19].mxu1  ;;  %v1777_v53 = vpop.eup %1776  ;;  %1796 = vtanh.f32 %v718_v43  ;;  %v720_v54 = vadd.f32 %v2066_v31, %v576_v49  ;;  %v891_v61 = vmul.f32 %v1775_v47, %v2082_v56 }
 0x122   : > { %v1779_v58 = vpop.eup %1778  ;;  %1798 = vtanh.f32 %v719_v48  ;;  %v892_v62 = vmul.f32 %v1777_v53, %v2086_v60  ;;  %v977_v1 = vadd.f32 %v890_v57, %v889_v51  ;;  %v760_v3 = vadd.f32 %v2066_v31, %v676_v52  ;;  %v580_v8 = vpop.f32.mrb[20].mxu0 }
 0x123   : > { %v1781_v63 = vpop.eup %1780  ;;  %1800 = vtanh.f32 %v720_v54  ;;  %v853_v0 = vmul.f32 %v1779_v58, %v2082_v56  ;;  %v680_v10 = vpop.f32.mrb[20].mxu1  ;;  %v721_v12 = vadd.f32 %v2063_v30, %v580_v8 }
 0x124   : > { %v1783_v4 = vpop.eup %1782  ;;  %921 = vadd.xlane.f32.xlu0 %v920_v50  ;;  %v854_v5 = vmul.f32 %v1781_v63, %v2086_v60  ;;  %1802 = vtanh.f32 %v757_v45  ;;  %v980_v6 = vadd.f32 %v892_v62, %v891_v61  ;;  %978 = vadd.xlane.f32.xlu1 %v977_v1  ;;  %v582_v13 = vpop.f32.mrb[21].mxu0  ;;  %v761_v21 = vadd.f32 %v2063_v30, %v680_v10 }
 0x125   : > { %v1785_v7 = vpop.eup %1784  ;;  %v855_v9 = vmul.f32 %v1783_v4, %v2082_v56  ;;  %1804 = vtanh.f32 %v758_v55  ;;  %v682_v16 = vpop.f32.mrb[21].mxu1  ;;  %v722_v18 = vadd.f32 %v2066_v31, %v582_v13 }
 0x126   : > { %v1787_v11 = vpop.eup %1786  ;;  %v923_v14 = vadd.f32 %v854_v5, %v853_v0  ;;  %v856_v15 = vmul.f32 %v1785_v7, %v2086_v60  ;;  %1806 = vtanh.f32 %v759_v59  ;;  %v584_v19 = vpop.f32.mrb[22].mxu0  ;;  %v762_v38 = vadd.f32 %v2066_v31, %v682_v16 }
 0x127   : > { %v1789_v17 = vpop.eup %1788  ;;  %1808 = vtanh.f32 %v760_v3  ;;  %v893_v20 = vmul.f32 %v1787_v11, %v2082_v56  ;;  %v684_v22 = vpop.f32.mrb[22].mxu1  ;;  %v723_v24 = vadd.f32 %v2063_v30, %v584_v19 }
 0x128   : > { %v1791_v23 = vpop.eup %1790  ;;  %1810 = vtanh.f32 %v721_v12  ;;  %v586_v28 = vpop.f32.mrb[23].mxu0  ;;  %924 = vadd.xlane.f32.xlu0 %v923_v14  ;;  %v926_v32 = vadd.f32 %v856_v15, %v855_v9  ;;  %v894_v33 = vmul.f32 %v1789_v17, %v2086_v60  ;;  %981 = vadd.xlane.f32.xlu1 %v980_v6  ;;  %v763_v42 = vadd.f32 %v2063_v30, %v684_v22 }
 0x129   : > { %v686_v34 = vpop.f32.mrb[23].mxu1  ;;  %v1793_v35 = vpop.eup %1792  ;;  %1812 = vtanh.f32 %v722_v18  ;;  %v724_v36 = vadd.f32 %v2066_v31, %v586_v28  ;;  %v895_v37 = vmul.f32 %v1791_v23, %v2082_v56 }
 0x12a   : > { %v1795_v39 = vpop.eup %1794  ;;  %1814 = vtanh.f32 %v723_v24  ;;  %v983_v40 = vadd.f32 %v894_v33, %v893_v20  ;;  %v896_v41 = vmul.f32 %v1793_v35, %v2086_v60  ;;  %v764_v45 = vadd.f32 %v2066_v31, %v686_v34  ;;  %v590_v50 = vpop.f32.mrb[24].mxu0 }
 0x12b   : > { %v1797_v43 = vpop.eup %1796  ;;  %1816 = vtanh.f32 %v724_v36  ;;  %v857_v44 = vmul.f32 %v1795_v39, %v2082_v56  ;;  %v725_v53 = vadd.f32 %v2063_v30, %v590_v50  ;;  %v592_v54 = vpop.f32.mrb[25].mxu0 }
 0x12c   : > { %v1799_v46 = vpop.eup %1798  ;;  %927 = vadd.xlane.f32.xlu0 %v926_v32  ;;  %v858_v47 = vmul.f32 %v1797_v43, %v2086_v60  ;;  %v986_v48 = vadd.f32 %v896_v41, %v895_v37  ;;  %1818 = vtanh.f32 %v761_v21  ;;  %984 = vadd.xlane.f32.xlu1 %v983_v40  ;;  %v726_v59 = vadd.f32 %v2066_v31, %v592_v54  ;;  %v594_v61 = vpop.f32.mrb[26].mxu0 }
 0x12d   : > { %v1801_v49 = vpop.eup %1800  ;;  %v859_v51 = vmul.f32 %v1799_v46, %v2082_v56  ;;  %1820 = vtanh.f32 %v762_v38  ;;  %v727_v0 = vadd.f32 %v2063_v30, %v594_v61  ;;  %v596_v1 = vpop.f32.mrb[27].mxu0 }
 0x12e   : > { %v1803_v52 = vpop.eup %1802  ;;  %v929_v55 = vadd.f32 %v858_v47, %v857_v44  ;;  %v860_v57 = vmul.f32 %v1801_v49, %v2086_v60  ;;  %1822 = vtanh.f32 %v763_v42  ;;  %v728_v6 = vadd.f32 %v2066_v31, %v596_v1 }
 0x12f   : > { %v1805_v58 = vpop.eup %1804  ;;  %v897_v62 = vmul.f32 %v1803_v52, %v2082_v56  ;;  %1824 = vtanh.f32 %v764_v45 }
 0x130   : > { %v1807_v63 = vpop.eup %1806  ;;  %1826 = vtanh.f32 %v725_v53  ;;  %930 = vadd.xlane.f32.xlu0 %v929_v55  ;;  %v932_v3 = vadd.f32 %v860_v57, %v859_v51  ;;  %v898_v4 = vmul.f32 %v1805_v58, %v2086_v60  ;;  %987 = vadd.xlane.f32.xlu1 %v986_v48 }
 0x131   : > { %v1809_v5 = vpop.eup %1808  ;;  %1828 = vtanh.f32 %v726_v59  ;;  %v899_v7 = vmul.f32 %v1807_v63, %v2082_v56 }
 0x132   : > { %v1811_v8 = vpop.eup %1810  ;;  %1830 = vtanh.f32 %v727_v0  ;;  %v989_v9 = vadd.f32 %v898_v4, %v897_v62  ;;  %v900_v10 = vmul.f32 %v1809_v5, %v2086_v60  ;;  %v600_v17 = vpop.f32.mrb[28].mxu0 }
 0x133   : > { %v1813_v11 = vpop.eup %1812  ;;  %1832 = vtanh.f32 %v728_v6  ;;  %v861_v12 = vmul.f32 %v1811_v8, %v2082_v56  ;;  %v729_v20 = vadd.f32 %v2063_v30, %v600_v17  ;;  %v602_v21 = vpop.f32.mrb[29].mxu0 }
 0x134   : > { %v1815_v13 = vpop.eup %1814  ;;  %933 = vadd.xlane.f32.xlu0 %v932_v3  ;;  %v862_v14 = vmul.f32 %v1813_v11, %v2086_v60  ;;  %v2171_v15 = vadd.f32 %v900_v10, %v899_v7  ;;  %990 = vadd.xlane.f32.xlu1 %v989_v9  ;;  %v730_v28 = vadd.f32 %v2066_v31, %v602_v21  ;;  %v604_v32 = vpop.f32.mrb[30].mxu0 }
 0x135   : > { %v1817_v16 = vpop.eup %1816  ;;  %v863_v18 = vmul.f32 %v1815_v13, %v2082_v56  ;;  %1834 = vtanh.f32 %v729_v20  ;;  %v731_v35 = vadd.f32 %v2063_v30, %v604_v32  ;;  %v606_v36 = vpop.f32.mrb[31].mxu0 }
 0x136   : > { %v1819_v19 = vpop.eup %1818  ;;  %v935_v22 = vadd.f32 %v862_v14, %v861_v12  ;;  %v864_v23 = vmul.f32 %v1817_v16, %v2086_v60  ;;  %1836 = vtanh.f32 %v730_v28  ;;  %v732_v40 = vadd.f32 %v2066_v31, %v606_v36 }
 0x137   : > { %v1821_v24 = vpop.eup %1820  ;;  %v901_v33 = vmul.f32 %v1819_v19, %v2082_v56  ;;  %1838 = vtanh.f32 %v731_v35 }
 0x138   : > { %v1823_v34 = vpop.eup %1822  ;;  %936 = vadd.xlane.f32.xlu0 %v935_v22  ;;  %v938_v37 = vadd.f32 %v864_v23, %v863_v18  ;;  %v902_v38 = vmul.f32 %v1821_v24, %v2086_v60  ;;  %1840 = vtanh.f32 %v732_v40 }
 0x139   : > { %v1825_v39 = vpop.eup %1824  ;;  %v903_v41 = vmul.f32 %v1823_v34, %v2082_v56 }
 0x13a   : > { %v1827_v42 = vpop.eup %1826  ;;  %v2182_v43 = vadd.f32 %v902_v38, %v901_v33  ;;  %v904_v44 = vmul.f32 %v1825_v39, %v2086_v60  ;;  %v610_v51 = vpop.f32.mrb[32].mxu0 }
 0x13b   : > { %v1829_v45 = vpop.eup %1828  ;;  %v865_v46 = vmul.f32 %v1827_v42, %v2082_v56  ;;  %v733_v53 = vadd.f32 %v2063_v30, %v610_v51  ;;  %v612_v54 = vpop.f32.mrb[33].mxu0 }
 0x13c   : > { %v1831_v47 = vpop.eup %1830  ;;  %939 = vadd.xlane.f32.xlu0 %v938_v37  ;;  %v866_v48 = vmul.f32 %v1829_v45, %v2086_v60  ;;  %v2187_v49 = vadd.f32 %v904_v44, %v903_v41  ;;  %v734_v58 = vadd.f32 %v2066_v31, %v612_v54  ;;  %v614_v59 = vpop.f32.mrb[34].mxu0 }
 0x13d   : > { %v1833_v50 = vpop.eup %1832  ;;  %v867_v52 = vmul.f32 %v1831_v47, %v2082_v56  ;;  %1842 = vtanh.f32 %v733_v53  ;;  %v735_v61 = vadd.f32 %v2063_v30, %v614_v59  ;;  %v616_v62 = vpop.f32.mrb[35].mxu0 }
 0x13e   : > { %v941_v55 = vadd.f32 %v866_v48, %v865_v46  ;;  %v868_v57 = vmul.f32 %v1833_v50, %v2086_v60  ;;  %1844 = vtanh.f32 %v734_v58  ;;  %v736_v0 = vadd.f32 %v2066_v31, %v616_v62 }
 0x13f   : > { %v1835_v1 = vpop.eup %1834  ;;  %1846 = vtanh.f32 %v735_v61 }
 0x140   : > { %942 = vadd.xlane.f32.xlu0 %v941_v55  ;;  %v944_v63 = vadd.f32 %v868_v57, %v867_v52  ;;  %v1837_v3 = vpop.eup %1836  ;;  %1848 = vtanh.f32 %v736_v0  ;;  %v869_v4 = vmul.f32 %v1835_v1, %v2082_v56  ;;  %v2255_v0 = vand.u32 127, %v691_v25 }
 0x141   : > { %v1839_v5 = vpop.eup %1838  ;;  %v870_v6 = vmul.f32 %v1837_v3, %v2086_v60 }
 0x142   : > { %v1841_v7 = vpop.eup %1840  ;;  %v620_v8 = vpop.f32.mrb[36].mxu0  ;;  %v871_v9 = vmul.f32 %v1839_v5, %v2082_v56  ;;  %v1052_v3 = vadd.s32 4294967288, %v2255_v0  ;;  %v1066_v5 = vadd.s32 4294967272, %v2255_v0 }
 0x143   : > { %v737_v10 = vadd.f32 %v2063_v30, %v620_v8  ;;  %v622_v11 = vpop.f32.mrb[37].mxu0  ;;  %v947_v12 = vadd.f32 %v870_v6, %v869_v4  ;;  %v872_v13 = vmul.f32 %v1841_v7, %v2086_v60  ;;  %v1059_v4 = vadd.s32 4294967280, %v2255_v0 }
 0x144   : > { %945 = vadd.xlane.f32.xlu0 %v944_v63  ;;  %v738_v14 = vadd.f32 %v2066_v31, %v622_v11  ;;  %v624_v16 = vpop.f32.mrb[38].mxu0  ;;  %v1073_v6 = vadd.s32 4294967264, %v2255_v0  ;;  %v2267_v8 = vsub.s32 %v2255_v0, %v2050_v26  ;;  %v2272_v11 = vsub.s32 %v1052_v3, %v2050_v26 }
 0x145   : > { %1850 = vtanh.f32 %v737_v10  ;;  %v739_v17 = vadd.f32 %v2063_v30, %v624_v16  ;;  %v626_v18 = vpop.f32.mrb[39].mxu0  ;;  %v950_v19 = vadd.f32 %v872_v13, %v871_v9  ;;  %v1080_v9 = vadd.s32 4294967256, %v2255_v0 }
 0x146   : > { %1852 = vtanh.f32 %v738_v14  ;;  %v740_v20 = vadd.f32 %v2066_v31, %v626_v18  ;;  %v1087_v10 = vadd.s32 4294967248, %v2255_v0  ;;  %v1094_v13 = vadd.s32 4294967240, %v2255_v0 }
 0x147   : > { %v1843_v21 = vpop.eup %1842  ;;  %1854 = vtanh.f32 %v739_v17  ;;  %v1101_v16 = vadd.s32 4294967232, %v2255_v0  ;;  %v1108_v17 = vadd.s32 4294967224, %v2255_v0  ;;  %v2283_v18 = vsub.s32 %v1066_v5, %v2050_v26 }
 0x148   : > { %948 = vadd.xlane.f32.xlu0 %v947_v12  ;;  %v1845_v22 = vpop.eup %1844  ;;  %1856 = vtanh.f32 %v740_v20  ;;  %v873_v23 = vmul.f32 %v1843_v21, %v2082_v56  ;;  %v2275_v12 = vsub.s32 %v1059_v4, %v2050_v26  ;;  %v1115_v20 = vadd.s32 4294967216, %v2255_v0 }
 0x149   : > { %v1847_v24 = vpop.eup %1846  ;;  %v874_v28 = vmul.f32 %v1845_v22, %v2086_v60  ;;  %v2290_v21 = vsub.s32 %v1080_v9, %v2050_v26  ;;  %v2293_v22 = vsub.s32 %v1087_v10, %v2050_v26 }
 0x14a   : > { %v1849_v32 = vpop.eup %1848  ;;  %v875_v33 = vmul.f32 %v1847_v24, %v2082_v56  ;;  %v1122_v24 = vadd.s32 4294967208, %v2255_v0 }
 0x14b   : > { %v953_v30 = vadd.f32 %v874_v28, %v873_v23  ;;  %v876_v34 = vmul.f32 %v1849_v32, %v2086_v60  ;;  %v2296_v23 = vsub.s32 %v1094_v13, %v2050_v26  ;;  %v1129_v28 = vadd.s32 4294967200, %v2255_v0 }
 0x14c   : > { %951 = vadd.xlane.f32.xlu0 %v950_v19  ;;  %v2286_v19 = vsub.s32 %v1073_v6, %v2050_v26 }
 0x14d   : > { %954 = vadd.xlane.f32.xlu1 %v953_v30  ;;  %v956_v35 = vadd.f32 %v876_v34, %v875_v33  ;;  %v2308_v34 = vsub.s32 %v1101_v16, %v2050_v26 }
 0x14f   : > { %v1851_v36 = vpop.eup %1850 }
 0x150   : > { %v1853_v31 = vpop.eup %1852  ;;  %v877_v37 = vmul.f32 %v1851_v36, %v2082_v56  ;;  %v1136_v36 = vadd.s32 4294967192, %v2255_v0 }
 0x151   : > { %v1855_v38 = vpop.eup %1854  ;;  %957 = vadd.xlane.f32.xlu1 %v956_v35  ;;  %v878_v39 = vmul.f32 %v1853_v31, %v2086_v60  ;;  %v2311_v35 = vsub.s32 %v1108_v17, %v2050_v26 }
 0x152   : > { %v1857_v40 = vpop.eup %1856  ;;  %v879_v41 = vmul.f32 %v1855_v38, %v2082_v56  ;;  %v1143_v38 = vadd.s32 4294967184, %v2255_v0 }
 0x153   : > { %v959_v42 = vadd.f32 %v878_v39, %v877_v37  ;;  %v880_v44 = vmul.f32 %v1857_v40, %v2086_v60  ;;  %v2317_v37 = vsub.s32 %v1115_v20, %v2050_v26  ;;  %v1009_v20 = vstv %s2303_s11 }
 0x154   : > { %v2344_v5 = vsub.s32 %v1143_v38, %v2050_v26 }
 0x155   : > { %960 = vadd.xlane.f32.xlu1 %v959_v42  ;;  %v962_v45 = vadd.f32 %v880_v44, %v879_v41  ;;  %v1150_v41 = vadd.s32 4294967176, %v2255_v0  ;;  %v2328_v44 = vsub.s32 %v1122_v24, %v2050_v26 }
 0x159   : > { %963 = vadd.xlane.f32.xlu1 %v962_v45  ;;  %v2331_v45 = vsub.s32 %v1129_v28, %v2050_v26 }
 0x15d   : > { %993 = vadd.xlane.f32.xlu1 %v2171_v15 }
 0x161   : > { %996 = vadd.xlane.f32.xlu1 %v2182_v43 }
 0x165   : > { %999 = vadd.xlane.f32.xlu1 %v2187_v49 }
 0x19a   : > { %v2214_v46 = vpop.xlane.xlu0 %906 }
 0x19b   : > { %v1051_v39 = vrot.slane %v2214_v46, %v2267_v8 }
 0x19e   : > { %v2216_v47 = vpop.xlane.xlu0 %909 }
 0x19f   : > { %v2222_v56 = vpop.xlane.xlu1 %966  ;;  %v1056_v30 = vrot.slane %v2216_v47, %v2272_v11 }
 0x1a3   : > { %v2226_v51 = vpop.xlane.xlu1 %969 }
 0x1a4   : > { %v2218_v48 = vpop.xlane.xlu0 %912 }
 0x1a5   : > { %v1063_v31 = vrot.slane %v2218_v48, %v2275_v12  ;;  %v1058_v48 = vsel %vm1057_vm1, %v1056_v30, %v1051_v39 }
 0x1a8   : > { %v2220_v50 = vpop.xlane.xlu0 %915  ;;  %v2230_v15 = vpop.xlane.xlu1 %972 }
 0x1a9   : > { %v1070_v40 = vrot.slane %v2220_v50, %v2283_v18  ;;  %v2337_v50 = vsub.s32 %v1136_v36, %v2050_v26  ;;  %v1184_v36 = vrot.slane %v2226_v51, %v2290_v21 }
 0x1ac   : > { %v2234_v49 = vpop.xlane.xlu1 %975 }
 0x1ad   : > { %v2224_v60 = vpop.xlane.xlu0 %918  ;;  %v1194_v51 = vrot.slane %v2234_v49, %v2296_v23 }
 0x1ae   : > { %v1077_v42 = vrot.slane %v2224_v60, %v2286_v19  ;;  %v1065_v60 = vsel %vm1064_vm2, %v1063_v31, %v1058_v48 }
 0x1b1   : > { %v2228_v52 = vpop.xlane.xlu0 %921  ;;  %v2238_v54 = vpop.xlane.xlu1 %978 }
 0x1b2   : > { %v1084_v46 = vrot.slane %v2228_v52, %v2290_v21  ;;  %v1072_v52 = vsel %vm1071_vm3, %v1070_v40, %v1065_v60 }
 0x1b5   : > { %v2232_v43 = vpop.xlane.xlu0 %924  ;;  %v2242_v57 = vpop.xlane.xlu1 %981 }
 0x1b6   : > { %v1091_v4 = vrot.slane %v2232_v43, %v2293_v22  ;;  %v1079_v43 = vsel %vm1078_vm4, %v1077_v42, %v1072_v52 }
 0x1b7   : > { %v1086_v24 = vsel %vm1085_vm5, %v1084_v46, %v1079_v43 }
 0x1b9   : > { %v2236_v53 = vpop.xlane.xlu0 %927  ;;  %v2246_v59 = vpop.xlane.xlu1 %984 }
 0x1ba   : > { %v1098_v10 = vrot.slane %v2236_v53, %v2296_v23  ;;  %v1209_v48 = vrot.slane %v2246_v59, %v2317_v37 }
 0x1bd   : > { %v2240_v55 = vpop.xlane.xlu0 %930  ;;  %v2250_v62 = vpop.xlane.xlu1 %987 }
 0x1be   : > { %v1105_v16 = vrot.slane %v2240_v55, %v2308_v34 }
 0x1c1   : > { %v2244_v58 = vpop.xlane.xlu0 %933  ;;  %v2257_v1 = vpop.xlane.xlu1 %990 }
 0x1c2   : > { %v1112_v53 = vrot.slane %v2244_v58, %v2311_v35 }
 0x1c5   : > { %v2248_v61 = vpop.xlane.xlu0 %936 }
 0x1c6   : > { %v1119_v55 = vrot.slane %v2248_v61, %v2317_v37 }
 0x1c9   : > { %v2252_v63 = vpop.xlane.xlu0 %939 }
 0x1ca   : > { %v1126_v58 = vrot.slane %v2252_v63, %v2328_v44 }
 0x1cd   : > { %v2263_v7 = vpop.xlane.xlu0 %942 }
 0x1ce   : > { %v1133_v61 = vrot.slane %v2263_v7, %v2331_v45 }
 0x1d1   : > { %v2300_v32 = vpop.xlane.xlu0 %945 }
 0x1d2   : > { %v1140_v63 = vrot.slane %v2300_v32, %v2337_v50 }
 0x1d5   : > { %v949_v6 = vpop.xlane.xlu0 %948 }
 0x1d6   : > { %v1147_v7 = vrot.slane %v949_v6, %v2344_v5 }
 0x1d9   : > { %v952_v38 = vpop.xlane.xlu0 %951 }
 0x1da   : > { %v2278_v14 = vpop.xlane.xlu1 %954 }
 0x1db   : > { %v1160_v13 = vrot.slane %v2278_v14, %v2267_v8  ;;  %v1179_v8 = vrot.slane %v2222_v56, %v2286_v19  ;;  %v1093_v14 = vsel %vm1092_vm6, %v1091_v4, %v1086_v24  ;;  %v1189_v56 = vrot.slane %v2230_v15, %v2293_v22 }
 0x1dc   : > { %v1100_v31 = vsel %vm1099_vm7, %v1098_v10, %v1093_v14  ;;  %v1199_v15 = vrot.slane %v2238_v54, %v2308_v34  ;;  %v1219_v4 = vrot.slane %v2257_v1, %v2331_v45 }
 0x1dd   : > { %v1107_v19 = vsel %vm1106_vm8, %v1105_v16, %v1100_v31 }
 0x1de   : > { %v958_v33 = vpop.xlane.xlu1 %957  ;;  %v1114_v21 = vsel %vm1113_vm9, %v1112_v53, %v1107_v19 }
 0x1df   : > { %v1164_v3 = vrot.slane %v958_v33, %v2272_v11  ;;  %v2351_v11 = vsub.s32 %v1150_v41, %v2050_v26  ;;  %v1121_v22 = vsel %vm1120_vm10, %v1119_v55, %v1114_v21  ;;  %v1727_v21 = vld [vmem:[%s2495_s3 + $0x20] ss:$8 sps:$4 sm:$0xff]  }
 0x1e0   : > { %v1128_v49 = vsel %vm1127_vm11, %v1126_v58, %v1121_v22 }
 0x1e1   : > { %v1165_v28 = vsel %vm1057_vm1, %v1164_v3, %v1160_v13  ;;  %v1154_v23 = vrot.slane %v952_v38, %v2351_v11  ;;  %v1135_v54 = vsel %vm1134_vm12, %v1133_v61, %v1128_v49  ;;  %v1214_v3 = vrot.slane %v2250_v62, %v2328_v44  ;;  %v1721_v38 = vld [vmem:[%s2495_s3] ss:$8 sps:$4 sm:$0xff]  }
 0x1e2   : > { %v961_v47 = vpop.xlane.xlu1 %960 }
 0x1e3   : > { %v1169_v9 = vrot.slane %v961_v47, %v2275_v12  ;;  %v1004_v12 = vadd.s32 128, %v2255_v0  ;;  %v1204_v47 = vrot.slane %v2242_v57, %v2311_v35  ;;  %v1142_v57 = vsel %vm1141_vm13, %v1140_v63, %v1135_v54 }
 0x1e4   : > { %v1149_v60 = vsel %vm1148_vm14, %v1147_v7, %v1142_v57 }
 0x1e5   : > { %v1170_v30 = vsel %vm1064_vm2, %v1169_v9, %v1165_v28  ;;  %vm1011_vm0 = vcmp.lt.s32.totalorder %v1004_v12, %v1009_v20  ;;  %vm1013_vm1 = vcmp.lt.s32.totalorder %v1004_v12, 200  ;;  %vm2414_vm2 = vcmp.lt.s32.totalorder %v2255_v0, %v1009_v20 }
 0x1e6   : > { %v964_v17 = vpop.xlane.xlu1 %963  ;;  %v1156_v44 = vsel %vm1155_vm15, %v1154_v23, %v1149_v60 }
 0x1e7   : > { %v1174_v33 = vrot.slane %v964_v17, %v2283_v18 }
 0x1e9   : > { %v1175_v18 = vsel %vm1071_vm3, %v1174_v33, %v1170_v30  ;;  %vm2423_vm3 = vmand %vm1011_vm0, %vm1013_vm1  ;;  %v1904_v33 = vmov 0.0  }
 0x1ea   : > { %v1180_v39 = vsel %vm1078_vm4, %v1179_v8, %v1175_v18  ;;  %v994_v40 = vpop.xlane.xlu1 %993  ;;  %vm1240_vm4 = vcmask 1040384   ;;  %v1622_v8 = vsel %vm2414_vm2, 1.0, %v1904_v33  ;;  %v1623_v14 = vsel %vm2423_vm3, 1.0, %v1904_v33 }
 0x1eb   : > { %v1185_v41 = vsel %vm1085_vm5, %v1184_v36, %v1180_v39  ;;  %v1224_v6 = vrot.slane %v994_v40, %v2337_v50  ;;  %v1238_v50 = vsel %vm2414_vm2, %v1156_v44, -1e+30  ;;  %v1723_v39 = vld [vmem:[%s2495_s3 + $0x4] ss:$8 sps:$4 sm:$0xff]   ;;  %v1726_v40 = vld [vmem:[%s2495_s3 + $0x14] ss:$8 sps:$4 sm:$0xff]  }
 0x1ec   : > { %v1190_v42 = vsel %vm1092_vm6, %v1189_v56, %v1185_v41  ;;  %v1241_v16 = vsel %vm1240_vm4, %v1238_v50, -inf  ;;  %1402 = vmatprep.subr.bf16.mxu1 %v1723_v39  ;;  %v1905_v41 = vmov 1966171168   ;;  %vm2466_vm5 = vcmp.lt.s32.totalorder %v691_v25, 256 }
 0x1ed   : > { %v1195_v32 = vsel %vm1099_vm7, %v1194_v51, %v1190_v42  ;;  %v1724_v51 = vld [vmem:[%s2495_s3 + $0x10] ss:$8 sps:$4 sm:$0xff]   ;;  %vm1398_vm6 = vcmask 392192   ;;  %v1624_v25 = vld [vmem:[%s2496_s4 + $0x1] ss:$2 sm:$0x3] }
 0x1ee   : > { %v1200_v34 = vsel %vm1106_vm8, %v1199_v15, %v1195_v32  ;;  %v997_v46 = vpop.xlane.xlu1 %996  ;;  %v1328_v15 = vunpack.c.l.s4 %v1905_v41 }
 0x1ef   : > { %v1205_v35 = vsel %vm1113_vm9, %v1204_v47, %v1200_v34  ;;  %v1229_v52 = vrot.slane %v997_v46, %v2344_v5 }
 0x1f0   : > { %v1210_v59 = vsel %vm1120_vm10, %v1209_v48, %v1205_v35  ;;  %v1329_v22 = vunpack.c.0.s8 %v1328_v15 }
 0x1f1   : > { %v1215_v37 = vsel %vm1127_vm11, %v1214_v3, %v1210_v59  ;;  %v1395_v59 = vrot.slane %v1624_v25, %v2060_v29 }
 0x1f2   : > { %v1220_v9 = vsel %vm1134_vm12, %v1219_v4, %v1215_v37  ;;  %v1000_v10 = vpop.xlane.xlu1 %999  ;;  %v1332_v49 = vsub.s32 %v1329_v22, %v2050_v26  ;;  %v1391_v4 = vrot.slane %v1624_v25, %v2057_v27 }
 0x1f3   : > { %v1225_v1 = vsel %vm1141_vm13, %v1224_v6, %v1220_v9  ;;  %v1234_v45 = vrot.slane %v1000_v10, %v2351_v11 }
 0x1f4   : > { %v1230_v0 = vsel %vm1148_vm14, %v1229_v52, %v1225_v1 }
 0x1f5   : > { %v1235_v43 = vsel %vm1155_vm15, %v1234_v45, %v1230_v0 }
 0x1f6   : > { %v1239_v5 = vsel %vm2423_vm3, %v1235_v43, -1e+30 }
 0x1f7   : > { %v1242_v17 = vsel %vm1240_vm4, %v1239_v5, -inf }
 0x1f8   : > { %v1243_v11 = vmax.f32 %v1241_v16, %v1242_v17 }
 0x1fa   : > { %1244 = vmax.xlane.f32.xlu0 %v1243_v11 }
 0x287   : > { %v1245_v12 = vpop.xlane.xlu0 %1244 }
 0x288   : > { %v1246_v20 = vsub.f32 %v1238_v50, %v1245_v12  ;;  %v1247_v24 = vsub.f32 %v1239_v5, %v1245_v12 }
 0x28a   : > { %v1248_v53 = vmul.f32 1.442695, %v1246_v20  ;;  %v1250_v28 = vmul.f32 1.442695, %v1247_v24 }
 0x28c   : > { %1858 = vpow2.f32 %v1248_v53 }
 0x28d   : > { %1860 = vpow2.f32 %v1250_v28 }
 0x296   : > { %v1859_v55 = vpop.eup %1858 }
 0x297   : > { %v1861_v30 = vpop.eup %1860  ;;  %v1256_v36 = vmul.f32 %v1859_v55, %v1622_v8 }
 0x298   : > { %v1257_v31 = vmul.f32 %v1861_v30, %v1623_v14 }
 0x299   : > { %v1263_v58 = vpack.c.bf16 %v1256_v36, %v1256_v36  ;;  %v1258_v18 = vsel %vm1240_vm4, %v1256_v36, 0.0 }
 0x29a   : > { %v1264_v56 = vpack.c.bf16 %v1257_v31, %v1257_v31  ;;  %v1259_v19 = vsel %vm1240_vm4, %v1257_v31, 0.0 }
 0x29b   : > { %v1260_v61 = vadd.f32 %v1259_v19, %v1258_v18 }
 0x29c   : > { %1313 = vmatprep.mubr.bf16.mxu1 %v1264_v56 }
 0x29d   : > { %1314 = vmatmul.mubr.bf16.vlgmr.msra.gmra.mrb[24].mxu1 %v1263_v58  ;;  %1261 = vadd.xlane.f32.xlu1 %v1260_v61 }
 0x29e   : > { %1434 = vmatprep.mubr.bf16.mxu1 %v1903_v2  ;;  %1403 = vmatpush1.bf16.msra.mxu1 %v1721_v38  ;;  %v1729_v2 = vld [vmem:[%s2495_s3 + $0x24] ss:$8 sps:$4 sm:$0xff]  }
 0x29f   : > { %1404 = vmatprep.subr.bf16.mxu1 %v1726_v40 }
 0x2a2   : > { %1405 = vmatpush1.bf16.msra.mxu1 %v1724_v51 }
 0x2a3   : > { %1406 = vmatprep.subr.bf16.mxu1 %v1729_v2 }
 0x2a6   : > { %1407 = vmatpush1.bf16.msra.mxu1 %v1727_v21 }
 0x32a   : > { %v1262_v63 = vpop.xlane.xlu1 %1261 }
 0x32b   : > { %1862 = vrcp.f32 %v1262_v63 }
 0x335   : > { %v1863_v7 = vpop.eup %1862 }
 0x336   : > { %v1322_v42 = vmul.f32 %v1863_v7, %v1256_v36  ;;  %v1323_v47 = vmul.f32 %v1863_v7, %v1257_v31 }
 0x338   : > { %v1326_v23 = vcombine.low %v1322_v42, %v1323_v47 }
 0x33a   : > { %v1333_v32 = vrot.slane %v1326_v23, %v1332_v49 }
 0x33c   : > { %v1340_v54 = vrot.slane %v1333_v32, %v1332_v49 }
 0x33e   : > { %1346 = vst.msk [vmem:[%s285_s25] sm:$0x3] %vm2466_vm5, %v1340_v54 }
 0x370   : > { %v1651_v34 = vpop.f32.mrb[24].mxu1 }
 0x371   : > { %v1652_v46 = vpop.f32.mrb[25].mxu1 }
 0x372   : > { %v1653_v3 = vadd.f32 %v1652_v46, %v1651_v34  ;;  %v1654_v57 = vpop.f32.mrb[26].mxu1 }
 0x373   : > { %v1655_v26 = vpop.f32.mrb[27].mxu1 }
 0x374   : > { %v1347_v35 = vmul.f32 %v1863_v7, %v1653_v3 }
 0x376   : > { %v1348_v60 = vpack.c.bf16 %v1347_v35, %v1347_v35 }
 0x378   : > { %1631 = vmatmul.mubr.msk.bf16.vlgmr.msra.gmra.mrb[28].mxu1 %vm1398_vm6, %v1348_v60 }
 0x44b   : > { %v1436_v37 = vpop.f32.mrb[28].mxu1 }
 0x44c   : > { %v1437_v6 = vadd.f32 %v1436_v37, %v1391_v4  ;;  %v1438_v62 = vpop.f32.mrb[29].mxu1 }
 0x44d   : > { %v1439_v44 = vadd.f32 %v1438_v62, %v1395_v59  ;;  %v1440_v9 = vpop.f32.mrb[30].mxu1 }
 0x44e   : > { %v1441_v52 = vpop.f32.mrb[31].mxu1 }
 0x44f   : > { %v1445_v10 = vcombine.low %v1437_v6, %v1439_v44 }
 0x451   : > { %v1452_v1 = vrot.slane %v1445_v10, %v1332_v49 }
 0x453   : > { %v1459_v45 = vrot.slane %v1452_v1, %v1332_v49 }
 0x455   : > { %1461 = vst.msk [vmem:[%s281_s10] sm:$0x3] %vm2466_vm5, %v1459_v45 }
 0x456 PF: > { %s23_s28 = sadd.s32 1, %s1900_s28   ;;  %s2505_s26 = smov %s1896_s27 }
 0x457   : > { %p20_p10 = scmp.ge.s32.totalorder %s23_s28, 4   ;;  %s2506_s27 = smov %s2508_s0 }
 0x459   :  { %22 = sbr.rel (!%p20_p10) target bundleno = 17 (0x11), region = 82 }

</bundles_post_ra>
